<compile_context>
chip_gen: v7x
topology: tpu7x:2x2x1
jax: 0.10.0
libtpu: 0.0.40
codegen_flags: <defaults>
</compile_context>

<pallas_src>
import jax
import jax.numpy as jnp
from jax import lax
from jax.experimental import pallas as pl
from jax.experimental.pallas import tpu as pltpu

EPS = 1e-5
LANE = 128
VMEM_BUDGET = 24 * 1024 * 1024   # target working-set per stage (fits v7x)
VMEM_LIMIT = 32 * 1024 * 1024


def _round_up(x, m):
    return ((x + m - 1) // m) * m


def _matmul_stats_kernel(patches_ref, w_ref, y_ref, stats_ref):
    """Pass 1: bf16 matmul with f32 accumulation + per-tile channel sum/sumsq."""
    acc = jnp.dot(patches_ref[...], w_ref[...],
                  preferred_element_type=jnp.float32)          # (TP, C) f32
    y_ref[...] = acc
    s = jnp.sum(acc, axis=0, keepdims=True)                    # (1, C)
    ss = jnp.sum(acc * acc, axis=0, keepdims=True)             # (1, C)
    stats_ref[...] = jnp.concatenate([s, ss], axis=0)[None, :, :]   # (1, 2, C)


def _bn_relu_kernel(y_ref, scale_ref, shift_ref, out_ref):
    """Pass 2: folded BatchNorm affine (y*scale + shift) followed by ReLU."""
    y = y_ref[...] * scale_ref[...] + shift_ref[...]
    out_ref[...] = jnp.maximum(y, 0.0).astype(out_ref.dtype)


def _pick_tile_p(P, K_pad, C_pad):
    """Largest row tile that keeps double-buffered tiles + weights in budget."""
    w_bytes = K_pad * C_pad * 2                    # resident bf16 weights
    per_row = 2 * (K_pad * 2) + 2 * (C_pad * 4)    # 2x bf16 patches + 2x f32 Y
    tp = (VMEM_BUDGET - w_bytes) // max(per_row, 1)
    tp = int(max(256, min(2048, tp)))
    tp = min(tp, _round_up(P, 8))                  # don't over-pad tiny inputs
    return max(8, (tp // 8) * 8)                   # sublane multiple


def _conv_bn_relu(x_nhwc, w_oihw, gamma, beta, *, out_dtype, tile_p=None):
    """One Conv2d(3x3, pad=1) + train-mode BatchNorm2d + ReLU stage (NHWC)."""
    N, H, W, Cin = x_nhwc.shape
    Cout = w_oihw.shape[0]
    K = 9 * Cin
    K_pad = _round_up(K, LANE)
    C_pad = _round_up(Cout, LANE)
    P = N * H * W

    if tile_p is None:
        tile_p = _pick_tile_p(P, K_pad, C_pad)
    tile_p = max(8, (int(tile_p) // 8) * 8)
    P_pad = _round_up(P, tile_p)
    num_tiles = P_pad // tile_p

    # --- im2col glue (bf16), tap order (dy, dx, cin) -------------------------
    xp = jnp.pad(x_nhwc.astype(jnp.bfloat16), ((0, 0), (1, 1), (1, 1), (0, 0)))
    taps = [xp[:, dy:dy + H, dx:dx + W, :] for dy in range(3) for dx in range(3)]
    patches = jnp.stack(taps, axis=3).reshape(P, K)
    patches = jnp.pad(patches, ((0, P_pad - P), (0, K_pad - K)))

    # OIHW -> (ky, kx, Cin, Cout) -> (9*Cin, Cout), padded to lane-dense shape.
    w_mat = jnp.transpose(w_oihw, (2, 3, 1, 0)).reshape(K, Cout).astype(jnp.bfloat16)
    w_mat = jnp.pad(w_mat, ((0, K_pad - K), (0, C_pad - Cout)))

    # --- pass 1: tiled matmul + partial BN statistics ------------------------
    flops1 = 2 * P_pad * K_pad * C_pad
    bytes1 = (P_pad * K_pad * 2 + K_pad * C_pad * 2
              + P_pad * C_pad * 4 + num_tiles * 2 * C_pad * 4)
    y, stats = pl.pallas_call(
        _matmul_stats_kernel,
        out_shape=(jax.ShapeDtypeStruct((P_pad, C_pad), jnp.float32),
                   jax.ShapeDtypeStruct((num_tiles, 2, C_pad), jnp.float32)),
        grid=(num_tiles,),
        in_specs=[
            pl.BlockSpec((tile_p, K_pad), lambda i: (i, 0)),
            pl.BlockSpec((K_pad, C_pad), lambda i: (0, 0)),
        ],
        out_specs=(
            pl.BlockSpec((tile_p, C_pad), lambda i: (i, 0)),
            pl.BlockSpec((1, 2, C_pad), lambda i: (i, 0, 0)),
        ),
        compiler_params=pltpu.CompilerParams(
            dimension_semantics=("parallel",),
            vmem_limit_bytes=VMEM_LIMIT),
        cost_estimate=pl.CostEstimate(
            flops=flops1, transcendentals=0, bytes_accessed=bytes1),
    )(patches, w_mat)

    # --- tiny cross-tile reduction + BN fold (plain JAX, per-channel) --------
    # Padded rows are exactly zero (no bias in kernel path) so they contribute
    # nothing to the sums; divide by the true element count P.
    s = jnp.sum(stats[:, 0, :], axis=0)
    ss = jnp.sum(stats[:, 1, :], axis=0)
    mean = s / P
    var = jnp.maximum(ss / P - mean * mean, 0.0)   # biased var; clamp cancellation
    gamma_p = jnp.pad(gamma.astype(jnp.float32), (0, C_pad - Cout))
    beta_p = jnp.pad(beta.astype(jnp.float32), (0, C_pad - Cout))
    inv_std = lax.rsqrt(var + EPS)
    scale = (gamma_p * inv_std).reshape(1, C_pad)
    shift = (beta_p - mean * gamma_p * inv_std).reshape(1, C_pad)

    # --- pass 2: tiled normalize + ReLU ---------------------------------------
    out_bytes = jnp.dtype(out_dtype).itemsize
    flops2 = 2 * P_pad * C_pad
    bytes2 = P_pad * C_pad * 4 + P_pad * C_pad * out_bytes + 2 * C_pad * 4
    out = pl.pallas_call(
        _bn_relu_kernel,
        out_shape=jax.ShapeDtypeStruct((P_pad, C_pad), out_dtype),
        grid=(num_tiles,),
        in_specs=[
            pl.BlockSpec((tile_p, C_pad), lambda i: (i, 0)),
            pl.BlockSpec((1, C_pad), lambda i: (0, 0)),
            pl.BlockSpec((1, C_pad), lambda i: (0, 0)),
        ],
        out_specs=pl.BlockSpec((tile_p, C_pad), lambda i: (i, 0)),
        compiler_params=pltpu.CompilerParams(
            dimension_semantics=("parallel",),
            vmem_limit_bytes=VMEM_LIMIT),
        cost_estimate=pl.CostEstimate(
            flops=flops2, transcendentals=0, bytes_accessed=bytes2),
    )(y, scale, shift)

    return out[:P, :Cout].reshape(N, H, W, Cout)


def vgg_block(x_nchw, params, *, tile_p=None):
    """VGGBlock forward. x_nchw: (N, Cin, H, W) float32. Returns NCHW f32.

    Note: conv biases (params["b1"], params["b2"]) are intentionally NOT fed to
    the kernels — train-mode BatchNorm subtracts the batch mean, cancelling any
    per-channel additive bias exactly.
    """
    x = jnp.transpose(x_nchw, (0, 2, 3, 1))                      # NCHW -> NHWC
    y = _conv_bn_relu(x, params["w1"], params["g1"], params["be1"],
                      out_dtype=jnp.bfloat16, tile_p=tile_p)     # bf16 handoff
    y = _conv_bn_relu(y, params["w2"], params["g2"], params["be2"],
                      out_dtype=jnp.float32, tile_p=tile_p)
    return jnp.transpose(y, (0, 3, 1, 2))                        # NHWC -> NCHW


def _reference(x_nchw, params):
    """Pure-JAX f32 reference (conv + bias + train-mode BN + ReLU)."""
    def stage(x, w, b, g, be):
        y = lax.conv_general_dilated(
            x, w, window_strides=(1, 1), padding=((1, 1), (1, 1)),
            dimension_numbers=("NCHW", "OIHW", "NCHW"))
        y = y + b[None, :, None, None]
        mean = jnp.mean(y, axis=(0, 2, 3), keepdims=True)
        var = jnp.mean((y - mean) ** 2, axis=(0, 2, 3), keepdims=True)
        y = (y - mean) * lax.rsqrt(var + EPS)
        y = g[None, :, None, None] * y + be[None, :, None, None]
        return jnp.maximum(y, 0.0)

    y = stage(x_nchw, params["w1"], params["b1"], params["g1"], params["be1"])
    y = stage(y, params["w2"], params["b2"], params["g2"], params["be2"])
    return y


def make_params(key, in_channels, middle_channels, out_channels):
    ks = jax.random.split(key, 8)
    return {
        "w1": 0.1 * jax.random.normal(ks[0], (middle_channels, in_channels, 3, 3), jnp.float32),
        "b1": 0.1 * jax.random.normal(ks[1], (middle_channels,), jnp.float32),
        "g1": 1.0 + 0.1 * jax.random.normal(ks[2], (middle_channels,), jnp.float32),
        "be1": 0.1 * jax.random.normal(ks[3], (middle_channels,), jnp.float32),
        "w2": 0.1 * jax.random.normal(ks[4], (out_channels, middle_channels, 3, 3), jnp.float32),
        "b2": 0.1 * jax.random.normal(ks[5], (out_channels,), jnp.float32),
        "g2": 1.0 + 0.1 * jax.random.normal(ks[6], (out_channels,), jnp.float32),
        "be2": 0.1 * jax.random.normal(ks[7], (out_channels,), jnp.float32),
    }


if __name__ == "__main__":
    key = jax.random.PRNGKey(0)
    k_x, k_p = jax.random.split(key)

    N, Cin, H, W = 2, 4, 16, 16
    Cmid, Cout = 8, 4

    x = jax.random.normal(k_x, (N, Cin, H, W), jnp.float32)
    params = make_params(k_p, Cin, Cmid, Cout)
    ref = _reference(x, params)

    # Default (auto) tile size.
    out = jax.block_until_ready(vgg_block(x, params))
    assert out.shape == (N, Cout, H, W)
    assert jnp.allclose(out, ref, rtol=3e-2, atol=3e-2), "mismatch vs reference"

    # Force multiple row tiles + padded rows to exercise the tiled two-pass BN.
    out_tiled = jax.block_until_ready(vgg_block(x, params, tile_p=96))
    assert jnp.allclose(out_tiled, ref, rtol=3e-2, atol=3e-2), "tiled mismatch"

    print("KERNEL_OK")
</pallas_src>

<mosaic_0001>
module attributes {stable_mosaic.version = 11 : i64} {
  func.func @_matmul_stats_kernel(%arg0: i32, %arg1: memref<512x128xbf16, #tpu.memory_space<vmem>>, %arg2: memref<128x128xbf16, #tpu.memory_space<vmem>>, %arg3: memref<512x128xf32, #tpu.memory_space<vmem>>, %arg4: memref<1x2x128xf32, #tpu.memory_space<vmem>>) attributes {dimension_semantics = [#tpu.dimension_semantics<parallel>], iteration_bounds = array<i64: 1>, scalar_prefetch = 0 : i64, scratch_operands = 0 : i64, tpu.core_type = #tpu.core_type<tc>, window_params = [{transform_indices = @transform_0, window_bounds = array<i64: 512, 128>}, {pipeline_mode = #tpu.pipeline_mode<synchronous>, transform_indices = @transform_1, window_bounds = array<i64: 128, 128>}, {transform_indices = @transform_2, window_bounds = array<i64: 512, 128>}, {transform_indices = @transform_3, window_bounds = array<i64: 1, 2, 128>}]} {
    %c0 = arith.constant 0 : index
    %c0_0 = arith.constant 0 : index
    %0 = vector.load %arg1[%c0, %c0_0] : memref<512x128xbf16, #tpu.memory_space<vmem>>, vector<512x128xbf16>
    %c0_1 = arith.constant 0 : index
    %c0_2 = arith.constant 0 : index
    %1 = vector.load %arg2[%c0_1, %c0_2] : memref<128x128xbf16, #tpu.memory_space<vmem>>, vector<128x128xbf16>
    %cst = arith.constant dense<0.000000e+00> : vector<512x128xf32>
    %2 = tpu.matmul %0, %1, %cst {dimension_numbers = #tpu.dot_dimension_numbers<[1], [0], [0], [1], [0, 0, 1, 1], [], []>} : vector<512x128xbf16>, vector<128x128xbf16>, vector<512x128xf32> -> vector<512x128xf32>
    %c0_3 = arith.constant 0 : index
    %c0_4 = arith.constant 0 : index
    %3 = vector.load %arg3[%c0_3, %c0_4] : memref<512x128xf32, #tpu.memory_space<vmem>>, vector<512x128xf32>
    tpu.vector_store %arg3[%c0_3, %c0_4], %2 {strides = array<i32>} : memref<512x128xf32, #tpu.memory_space<vmem>>, vector<512x128xf32>,
    %cst_5 = arith.constant dense<0.000000e+00> : vector<128xf32>
    %4 = vector.multi_reduction <add>, %2, %cst_5 [0] : vector<512x128xf32> to vector<128xf32>
    %5 = vector.shape_cast %4 : vector<128xf32> to vector<1x128xf32>
    %6 = arith.mulf %2, %2 : vector<512x128xf32>
    %cst_6 = arith.constant dense<0.000000e+00> : vector<128xf32>
    %7 = vector.multi_reduction <add>, %6, %cst_6 [0] : vector<512x128xf32> to vector<128xf32>
    %8 = vector.shape_cast %7 : vector<128xf32> to vector<1x128xf32>
    %9 = tpu.concatenate %5, %8 in 0 : vector<1x128xf32>, vector<1x128xf32> -> vector<2x128xf32>
    %10 = vector.shape_cast %9 : vector<2x128xf32> to vector<1x2x128xf32>
    %c0_7 = arith.constant 0 : index
    %c0_8 = arith.constant 0 : index
    %c0_9 = arith.constant 0 : index
    %11 = vector.load %arg4[%c0_7, %c0_8, %c0_9] : memref<1x2x128xf32, #tpu.memory_space<vmem>>, vector<1x2x128xf32>
    tpu.vector_store %arg4[%c0_7, %c0_8, %c0_9], %10 {strides = array<i32>} : memref<1x2x128xf32, #tpu.memory_space<vmem>>, vector<1x2x128xf32>,
    return
  }
  func.func @transform_0(%arg0: i32) -> (i32, i32) {
    %c0_i32 = arith.constant 0 : i32
    %c0_i32_0 = arith.constant 0 : i32
    return %arg0, %c0_i32 : i32, i32
  }
  func.func @transform_1(%arg0: i32) -> (i32, i32) {
    %c0_i32 = arith.constant 0 : i32
    %c0_i32_0 = arith.constant 0 : i32
    %c0_i32_1 = arith.constant 0 : i32
    return %c0_i32, %c0_i32_0 : i32, i32
  }
  func.func @transform_2(%arg0: i32) -> (i32, i32) {
    %c0_i32 = arith.constant 0 : i32
    %c0_i32_0 = arith.constant 0 : i32
    return %arg0, %c0_i32 : i32, i32
  }
  func.func @transform_3(%arg0: i32) -> (i32, i32, i32) {
    %c0_i32 = arith.constant 0 : i32
    %c0_i32_0 = arith.constant 0 : i32
    %c0_i32_1 = arith.constant 0 : i32
    return %arg0, %c0_i32, %c0_i32_0 : i32, i32, i32
  }
}

</mosaic_0001>

<bundles_post_ra>
// kernel: tpu_custom_call.1
= control target key start
LH: loop header
LB: loop body
LE: loop exit
PB: predicated region body
PF: predicated region fallthrough
CT: control target
= control target key end

     0   :  { %9 = vsyncpa [#allocation3], 0  ;;  %s1542_s0 = inlined_call_operand.hbm [shape: bf16[512,128], index: 0, kind: input, shape index: {}]   ;;  %s1543_s1 = inlined_call_operand.hbm [shape: bf16[128,128], index: 1, kind: input, shape index: {}]   ;;  %s1544_s2 = inlined_call_operand.hbm [shape: f32[512,128], index: 2, kind: output, shape index: {0}]   ;;  %s1545_s3 = inlined_call_operand.hbm [shape: f32[1,2,128], index: 3, kind: output, shape index: {1}]  }
   0x1   :  { %10 = vsyncpa [#allocation6], 0 }
   0x2   :  { %11 = vsyncpa [#allocation4], 0 }
   0x3   :  { %12 = vsyncpa [#allocation9], 0  ;;  %s1274_s12 = smov [#allocation2]   ;;  %s1178_s16 = scalar_lea.hbm %s1542_s0, 4096 }
   0x4   :  { %s18_s13 = sshll.u32 %s1274_s12, 4  ;;  %p1179_p0 = scmp.ne.s32.totalorder %s1542_s0, %s1178_s16  ;;  %s19_s13 = int_to_ptr.vmem [resolvable:$true] %s18_s13 }
   0x5   :  { %p1182_p1 = scmp.lt.u32.totalorder %s1178_s16, %s1542_s0 }
   0x7   :  { %p1184_p2 = pnand %p1182_p1, %p1179_p0 }
   0x9   :  { %1187 = shalt.err (!%p1184_p2)
}
   0xa   :  { %s1188_s21 = scalar_lea.vmem %s19_s13, 4096  ;;  %p1193_p4 = scmp.lt.s32.totalorder %s19_s13, %s19_s13 }
   0xb   :  { %p1189_p3 = scmp.ne.s32.totalorder %s19_s13, %s1188_s21  ;;  %p1194_p5 = scmp.lt.s32.totalorder %s1188_s21, %s1188_s21 }
   0xd   :  { %p1195_p6 = por %p1194_p5, %p1193_p4 }
   0xf   :  { %p1196_p7 = pnand %p1195_p6, %p1189_p3 }
  0x11   :  { %1199 = shalt.err (!%p1196_p7)
}
  0x12   :  { %s1275_s22 = smov 64   ;;  %s1276_s23 = smov 4  }
  0x13   :  { %24 = dma.hbm_to_vmem [thread:$0]  %s1542_s0, 4096, %s19_s13, [#allocation3], %s1275_s22, %s1275_s22, %s1276_s23  }
  0x14   :  { %s1277_s26 = smov [#allocation5]   ;;  %s1200_s30 = scalar_lea.hbm %s1543_s1, 1024 }
  0x15   :  { %s30_s27 = sshll.u32 %s1277_s26, 4  ;;  %p1201_p8 = scmp.ne.s32.totalorder %s1543_s1, %s1200_s30  ;;  %s31_s27 = int_to_ptr.vmem [resolvable:$true] %s30_s27 }
  0x16   :  { %p1204_p9 = scmp.lt.u32.totalorder %s1200_s30, %s1543_s1 }
  0x18   :  { %p1206_p10 = pnand %p1204_p9, %p1201_p8 }
  0x1a   :  { %1209 = shalt.err (!%p1206_p10)
}
  0x1b   :  { %s1210_s8 = scalar_lea.vmem %s31_s27, 1024  ;;  %p1215_p12 = scmp.lt.s32.totalorder %s31_s27, %s31_s27 }
  0x1c   :  { %p1211_p11 = scmp.ne.s32.totalorder %s31_s27, %s1210_s8  ;;  %p1216_p13 = scmp.lt.s32.totalorder %s1210_s8, %s1210_s8 }
  0x1e   :  { %p1217_p0 = por %p1216_p13, %p1215_p12 }
  0x20   :  { %p1218_p1 = pnand %p1217_p0, %p1211_p11 }
  0x22   :  { %1221 = shalt.err (!%p1218_p1)
}
  0x23   :  { %36 = dma.hbm_to_vmem [thread:$0]  %s1543_s1, 1024, %s31_s27, [#allocation6], %s1275_s22, %s1275_s22, %s1276_s23  }
  0x24   :  { %1266 = dma.done.wait [#allocation3], 4096  }
  0x25   :  { %1267 = vsyncadd [#allocation3], 4294963200 }
  0x26   :  { %1268 = dma.done.wait [#allocation6], 1024  }
  0x27   :  { %1269 = vsyncadd [#allocation6], 4294966272  ;;  %v1138_v0 = vld [vmem:[#allocation5] sm:$0xff]   ;;  %v1139_v1 = vld [vmem:[#allocation5 + $0x8] sm:$0xff]   ;;  %s1278_s1 = smov [#allocation7]  }
  0x28   :  { %1034 = vmatprep.subr.bf16.mxu0 %v1138_v0  ;;  %1114 = vmatprep.subr.bf16.mxu1 %v1138_v0  ;;  %v1140_v2 = vld [vmem:[#allocation5 + $0x10] sm:$0xff]   ;;  %v1141_v3 = vld [vmem:[#allocation5 + $0x18] sm:$0xff]   ;;  %v1146_v4 = vld [vmem:[#allocation2] sm:$0xff]   ;;  %s927_s10 = sshll.u32 %s1278_s1, 4  ;;  %s928_s10 = int_to_ptr.vmem [resolvable:$true] %s927_s10 }
  0x29   :  { %1035 = vmatpush3.bf16.msra.mxu0 %v1138_v0  ;;  %1122 = vmatpush3.bf16.msra.mxu1 %v1138_v0  ;;  %v1142_v5 = vld [vmem:[#allocation5 + $0x20] sm:$0xff]   ;;  %v1143_v6 = vld [vmem:[#allocation5 + $0x28] sm:$0xff]   ;;  %v1144_v7 = vld [vmem:[#allocation5 + $0x30] sm:$0xff]   ;;  %s1222_s11 = scalar_lea.vmem %s928_s10, 8192  ;;  %p1227_p3 = scmp.lt.s32.totalorder %s928_s10, %s928_s10 }
  0x2a   :  { %1036 = vmatprep.subr.bf16.mxu0 %v1139_v1  ;;  %1115 = vmatprep.subr.bf16.mxu1 %v1139_v1  ;;  %v1145_v8 = vld [vmem:[#allocation5 + $0x38] sm:$0xff]   ;;  %v1162_v9 = vld [vmem:[#allocation2 + $0x80] sm:$0xff]   ;;  %v1147_v10 = vld [vmem:[#allocation2 + $0x8] sm:$0xff]   ;;  %p1223_p2 = scmp.ne.s32.totalorder %s928_s10, %s1222_s11  ;;  %p1228_p4 = scmp.lt.s32.totalorder %s1222_s11, %s1222_s11 }
  0x2b   :  { %1050 = vmatprep.mubr.bf16.mxu0 %v1146_v4  ;;  %1082 = vmatprep.mubr.bf16.mxu1 %v1162_v9  ;;  %v1148_v11 = vld [vmem:[#allocation2 + $0x10] sm:$0xff]   ;;  %v1163_v12 = vld [vmem:[#allocation2 + $0x88] sm:$0xff]   ;;  %v1149_v14 = vld [vmem:[#allocation2 + $0x18] sm:$0xff]  }
  0x2c   :  { %v1164_v13 = vld [vmem:[#allocation2 + $0x90] sm:$0xff]   ;;  %v1150_v15 = vld [vmem:[#allocation2 + $0x20] sm:$0xff]   ;;  %v1165_v16 = vld [vmem:[#allocation2 + $0x98] sm:$0xff]   ;;  %p1229_p5 = por %p1228_p4, %p1227_p3 }
  0x2d   :  { %1037 = vmatpush3.bf16.msra.mxu0 %v1139_v1  ;;  %1123 = vmatpush3.bf16.msra.mxu1 %v1139_v1  ;;  %v1166_v17 = vld [vmem:[#allocation2 + $0xa0] sm:$0xff]   ;;  %v1151_v18 = vld [vmem:[#allocation2 + $0x28] sm:$0xff]   ;;  %v1152_v20 = vld [vmem:[#allocation2 + $0x30] sm:$0xff]  }
  0x2e   :  { %1038 = vmatprep.subr.bf16.mxu0 %v1140_v2  ;;  %1116 = vmatprep.subr.bf16.mxu1 %v1140_v2  ;;  %v1167_v19 = vld [vmem:[#allocation2 + $0xa8] sm:$0xff]   ;;  %v1168_v21 = vld [vmem:[#allocation2 + $0xb0] sm:$0xff]   ;;  %v1153_v22 = vld [vmem:[#allocation2 + $0x38] sm:$0xff]   ;;  %p1230_p6 = pnand %p1229_p5, %p1223_p2 }
  0x2f   :  { %v1169_v23 = vld [vmem:[#allocation2 + $0xb8] sm:$0xff]   ;;  %v1154_v24 = vld [vmem:[#allocation2 + $0x40] sm:$0xff]   ;;  %v1155_v26 = vld [vmem:[#allocation2 + $0x48] sm:$0xff]  }
  0x30   :  { %v1170_v25 = vld [vmem:[#allocation2 + $0xc0] sm:$0xff]   ;;  %v1171_v27 = vld [vmem:[#allocation2 + $0xc8] sm:$0xff]   ;;  %v1156_v28 = vld [vmem:[#allocation2 + $0x50] sm:$0xff]  }
  0x31   :  { %1039 = vmatpush3.bf16.msra.mxu0 %v1140_v2  ;;  %1124 = vmatpush3.bf16.msra.mxu1 %v1140_v2  ;;  %v1172_v29 = vld [vmem:[#allocation2 + $0xd0] sm:$0xff]   ;;  %v1157_v30 = vld [vmem:[#allocation2 + $0x58] sm:$0xff]   ;;  %v1158_v32 = vld [vmem:[#allocation2 + $0x60] sm:$0xff]  }
  0x32   :  { %1040 = vmatprep.subr.bf16.mxu0 %v1141_v3  ;;  %1117 = vmatprep.subr.bf16.mxu1 %v1141_v3  ;;  %v1173_v31 = vld [vmem:[#allocation2 + $0xd8] sm:$0xff]   ;;  %v1174_v33 = vld [vmem:[#allocation2 + $0xe0] sm:$0xff]   ;;  %v1159_v34 = vld [vmem:[#allocation2 + $0x68] sm:$0xff]  }
  0x33   :  { %v1175_v35 = vld [vmem:[#allocation2 + $0xe8] sm:$0xff]   ;;  %v1160_v36 = vld [vmem:[#allocation2 + $0x70] sm:$0xff]   ;;  %v1161_v38 = vld [vmem:[#allocation2 + $0x78] sm:$0xff]  }
  0x34   :  { %v1176_v37 = vld [vmem:[#allocation2 + $0xf0] sm:$0xff]   ;;  %v1177_v39 = vld [vmem:[#allocation2 + $0xf8] sm:$0xff]  }
  0x35   :  { %1041 = vmatpush3.bf16.msra.mxu0 %v1141_v3  ;;  %1125 = vmatpush3.bf16.msra.mxu1 %v1141_v3 }
  0x36   :  { %1042 = vmatprep.subr.bf16.mxu0 %v1142_v5  ;;  %1118 = vmatprep.subr.bf16.mxu1 %v1142_v5 }
  0x39   :  { %1043 = vmatpush3.bf16.msra.mxu0 %v1142_v5  ;;  %1126 = vmatpush3.bf16.msra.mxu1 %v1142_v5 }
  0x3a   :  { %1044 = vmatprep.subr.bf16.mxu0 %v1143_v6  ;;  %1119 = vmatprep.subr.bf16.mxu1 %v1143_v6 }
  0x3d   :  { %1045 = vmatpush3.bf16.msra.mxu0 %v1143_v6  ;;  %1127 = vmatpush3.bf16.msra.mxu1 %v1143_v6 }
  0x3e   :  { %1046 = vmatprep.subr.bf16.mxu0 %v1144_v7  ;;  %1120 = vmatprep.subr.bf16.mxu1 %v1144_v7 }
  0x41   :  { %1047 = vmatpush3.bf16.msra.mxu0 %v1144_v7  ;;  %1128 = vmatpush3.bf16.msra.mxu1 %v1144_v7 }
  0x42   :  { %1048 = vmatprep.subr.bf16.mxu0 %v1145_v8  ;;  %1121 = vmatprep.subr.bf16.mxu1 %v1145_v8 }
  0x45   :  { %1049 = vmatpush3.bf16.msra.mxu0 %v1145_v8  ;;  %1129 = vmatpush3.bf16.msra.mxu1 %v1145_v8 }
  0x48   :  { %1051 = vmatmul.mubr.bf16.vlgmr.msra.gmra.mrb[0].mxu0 %v1147_v10  ;;  %1083 = vmatmul.mubr.bf16.vlgmr.msra.gmra.mrb[0].mxu1 %v1163_v12 }
  0x49   :  { %1054 = vmatprep.mubr.bf16.mxu0 %v1148_v11  ;;  %1086 = vmatprep.mubr.bf16.mxu1 %v1164_v13 }
  0x50   :  { %1055 = vmatmul.mubr.bf16.gmra.mrb[4].mxu0 %v1149_v14  ;;  %1087 = vmatmul.mubr.bf16.gmra.mrb[4].mxu1 %v1165_v16 }
  0x51   :  { %1058 = vmatprep.mubr.bf16.mxu0 %v1150_v15  ;;  %1090 = vmatprep.mubr.bf16.mxu1 %v1166_v17 }
  0x58   :  { %1059 = vmatmul.mubr.bf16.gmra.mrb[8].mxu0 %v1151_v18  ;;  %1091 = vmatmul.mubr.bf16.gmra.mrb[8].mxu1 %v1167_v19 }
  0x59   :  { %1062 = vmatprep.mubr.bf16.mxu0 %v1152_v20  ;;  %1094 = vmatprep.mubr.bf16.mxu1 %v1168_v21 }
  0x60   :  { %1063 = vmatmul.mubr.bf16.gmra.mrb[12].mxu0 %v1153_v22  ;;  %1095 = vmatmul.mubr.bf16.gmra.mrb[12].mxu1 %v1169_v23 }
  0x61   :  { %1066 = vmatprep.mubr.bf16.mxu0 %v1154_v24  ;;  %1098 = vmatprep.mubr.bf16.mxu1 %v1170_v25 }
  0x68   :  { %1067 = vmatmul.mubr.bf16.gmra.mrb[16].mxu0 %v1155_v26  ;;  %1099 = vmatmul.mubr.bf16.gmra.mrb[16].mxu1 %v1171_v27 }
  0x69   :  { %1070 = vmatprep.mubr.bf16.mxu0 %v1156_v28  ;;  %1102 = vmatprep.mubr.bf16.mxu1 %v1172_v29 }
  0x70   :  { %1071 = vmatmul.mubr.bf16.gmra.mrb[20].mxu0 %v1157_v30  ;;  %1103 = vmatmul.mubr.bf16.gmra.mrb[20].mxu1 %v1173_v31 }
  0x71   :  { %1074 = vmatprep.mubr.bf16.mxu0 %v1158_v32  ;;  %1106 = vmatprep.mubr.bf16.mxu1 %v1174_v33 }
  0x78   :  { %1075 = vmatmul.mubr.bf16.gmra.mrb[24].mxu0 %v1159_v34  ;;  %1107 = vmatmul.mubr.bf16.gmra.mrb[24].mxu1 %v1175_v35 }
  0x79   :  { %1078 = vmatprep.mubr.bf16.mxu0 %v1160_v36  ;;  %1110 = vmatprep.mubr.bf16.mxu1 %v1176_v37 }
  0x80   :  { %1079 = vmatmul.mubr.bf16.gmra.mrb[28].mxu0 %v1161_v38  ;;  %1111 = vmatmul.mubr.bf16.gmra.mrb[28].mxu1 %v1177_v39 }
 0x11b   :  { %v1052_v40 = vpop.f32.mrb[0].mxu0  ;;  %v1326_v41 = vpop.f32.mrb[0].mxu1 }
 0x11c   :  { %655 = vst [vmem:[#allocation7 + $0x10] sm:$0xff] %v1052_v40  ;;  %v398_v42 = vpop.f32.mrb[1].mxu0  ;;  %687 = vst [vmem:[#allocation7 + $0x110] sm:$0xff] %v1326_v41  ;;  %v1329_v43 = vpop.f32.mrb[1].mxu1  ;;  %v788_v51 = vmul.f32 %v1052_v40, %v1052_v40 }
 0x11d   :  { %653 = vst [vmem:[#allocation7] sm:$0xff] %v398_v42  ;;  %v1053_v44 = vpop.f32.mrb[2].mxu0  ;;  %685 = vst [vmem:[#allocation7 + $0x100] sm:$0xff] %v1329_v43  ;;  %v1332_v45 = vpop.f32.mrb[2].mxu1  ;;  %v786_v48 = vmul.f32 %v398_v42, %v398_v42 }
 0x11e   :  { %656 = vst [vmem:[#allocation7 + $0x18] sm:$0xff] %v1053_v44  ;;  %v401_v46 = vpop.f32.mrb[3].mxu0  ;;  %688 = vst [vmem:[#allocation7 + $0x118] sm:$0xff] %v1332_v45  ;;  %v1335_v47 = vpop.f32.mrb[3].mxu1  ;;  %v789_v54 = vmul.f32 %v1053_v44, %v1053_v44 }
 0x11f   :  { %654 = vst [vmem:[#allocation7 + $0x8] sm:$0xff] %v401_v46  ;;  %v717_v49 = vadd.f32 %v401_v46, %v398_v42  ;;  %v787_v50 = vmul.f32 %v401_v46, %v401_v46  ;;  %686 = vst [vmem:[#allocation7 + $0x108] sm:$0xff] %v1335_v47 }
 0x121   :  { %v718_v52 = vadd.f32 %v1052_v40, %v717_v49  ;;  %v850_v53 = vadd.f32 %v787_v50, %v786_v48 }
 0x123   :  { %v851_v55 = vadd.f32 %v850_v53, %v788_v51  ;;  %v1056_v56 = vpop.f32.mrb[4].mxu0  ;;  %v719_v57 = vadd.f32 %v1053_v44, %v718_v52  ;;  %v1338_v58 = vpop.f32.mrb[4].mxu1 }
 0x124   :  { %659 = vst [vmem:[#allocation7 + $0x30] sm:$0xff] %v1056_v56  ;;  %v414_v59 = vpop.f32.mrb[5].mxu0  ;;  %691 = vst [vmem:[#allocation7 + $0x130] sm:$0xff] %v1338_v58  ;;  %v1341_v60 = vpop.f32.mrb[5].mxu1  ;;  %v792_v7 = vmul.f32 %v1056_v56, %v1056_v56 }
 0x125   :  { %657 = vst [vmem:[#allocation7 + $0x20] sm:$0xff] %v414_v59  ;;  %v720_v61 = vadd.f32 %v719_v57, %v414_v59  ;;  %v790_v62 = vmul.f32 %v414_v59, %v414_v59  ;;  %v852_v63 = vadd.f32 %v851_v55, %v789_v54  ;;  %v1057_v0 = vpop.f32.mrb[6].mxu0  ;;  %689 = vst [vmem:[#allocation7 + $0x120] sm:$0xff] %v1341_v60  ;;  %v1344_v1 = vpop.f32.mrb[6].mxu1 }
 0x126   :  { %660 = vst [vmem:[#allocation7 + $0x38] sm:$0xff] %v1057_v0  ;;  %v417_v2 = vpop.f32.mrb[7].mxu0  ;;  %692 = vst [vmem:[#allocation7 + $0x138] sm:$0xff] %v1344_v1  ;;  %v1347_v3 = vpop.f32.mrb[7].mxu1  ;;  %v793_v10 = vmul.f32 %v1057_v0, %v1057_v0 }
 0x127   :  { %v853_v4 = vadd.f32 %v852_v63, %v790_v62  ;;  %658 = vst [vmem:[#allocation7 + $0x28] sm:$0xff] %v417_v2  ;;  %v721_v5 = vadd.f32 %v720_v61, %v417_v2  ;;  %v791_v6 = vmul.f32 %v417_v2, %v417_v2  ;;  %690 = vst [vmem:[#allocation7 + $0x128] sm:$0xff] %v1347_v3 }
 0x129   :  { %v722_v8 = vadd.f32 %v1056_v56, %v721_v5  ;;  %v854_v9 = vadd.f32 %v853_v4, %v791_v6 }
 0x12b   :  { %v855_v11 = vadd.f32 %v854_v9, %v792_v7  ;;  %v1060_v12 = vpop.f32.mrb[8].mxu0  ;;  %v723_v13 = vadd.f32 %v1057_v0, %v722_v8  ;;  %v1350_v14 = vpop.f32.mrb[8].mxu1 }
 0x12c   :  { %663 = vst [vmem:[#allocation7 + $0x50] sm:$0xff] %v1060_v12  ;;  %v430_v15 = vpop.f32.mrb[9].mxu0  ;;  %695 = vst [vmem:[#allocation7 + $0x150] sm:$0xff] %v1350_v14  ;;  %v1353_v16 = vpop.f32.mrb[9].mxu1  ;;  %v796_v27 = vmul.f32 %v1060_v12, %v1060_v12 }
 0x12d   :  { %661 = vst [vmem:[#allocation7 + $0x40] sm:$0xff] %v430_v15  ;;  %v724_v17 = vadd.f32 %v723_v13, %v430_v15  ;;  %v794_v18 = vmul.f32 %v430_v15, %v430_v15  ;;  %v856_v19 = vadd.f32 %v855_v11, %v793_v10  ;;  %v1061_v20 = vpop.f32.mrb[10].mxu0  ;;  %693 = vst [vmem:[#allocation7 + $0x140] sm:$0xff] %v1353_v16  ;;  %v1356_v21 = vpop.f32.mrb[10].mxu1 }
 0x12e   :  { %664 = vst [vmem:[#allocation7 + $0x58] sm:$0xff] %v1061_v20  ;;  %v433_v22 = vpop.f32.mrb[11].mxu0  ;;  %696 = vst [vmem:[#allocation7 + $0x158] sm:$0xff] %v1356_v21  ;;  %v1359_v23 = vpop.f32.mrb[11].mxu1  ;;  %v797_v30 = vmul.f32 %v1061_v20, %v1061_v20 }
 0x12f   :  { %v857_v24 = vadd.f32 %v856_v19, %v794_v18  ;;  %662 = vst [vmem:[#allocation7 + $0x48] sm:$0xff] %v433_v22  ;;  %v725_v25 = vadd.f32 %v724_v17, %v433_v22  ;;  %v795_v26 = vmul.f32 %v433_v22, %v433_v22  ;;  %694 = vst [vmem:[#allocation7 + $0x148] sm:$0xff] %v1359_v23 }
 0x131   :  { %v726_v28 = vadd.f32 %v1060_v12, %v725_v25  ;;  %v858_v29 = vadd.f32 %v857_v24, %v795_v26 }
 0x133   :  { %v859_v31 = vadd.f32 %v858_v29, %v796_v27  ;;  %v1064_v32 = vpop.f32.mrb[12].mxu0  ;;  %v727_v33 = vadd.f32 %v1061_v20, %v726_v28  ;;  %v1362_v34 = vpop.f32.mrb[12].mxu1 }
 0x134   :  { %667 = vst [vmem:[#allocation7 + $0x70] sm:$0xff] %v1064_v32  ;;  %v446_v35 = vpop.f32.mrb[13].mxu0  ;;  %699 = vst [vmem:[#allocation7 + $0x170] sm:$0xff] %v1362_v34  ;;  %v1365_v36 = vpop.f32.mrb[13].mxu1  ;;  %v800_v51 = vmul.f32 %v1064_v32, %v1064_v32 }
 0x135   :  { %665 = vst [vmem:[#allocation7 + $0x60] sm:$0xff] %v446_v35  ;;  %v728_v37 = vadd.f32 %v727_v33, %v446_v35  ;;  %v798_v38 = vmul.f32 %v446_v35, %v446_v35  ;;  %v860_v39 = vadd.f32 %v859_v31, %v797_v30  ;;  %v1065_v40 = vpop.f32.mrb[14].mxu0  ;;  %697 = vst [vmem:[#allocation7 + $0x160] sm:$0xff] %v1365_v36  ;;  %v1368_v42 = vpop.f32.mrb[14].mxu1 }
 0x136   :  { %668 = vst [vmem:[#allocation7 + $0x78] sm:$0xff] %v1065_v40  ;;  %v449_v44 = vpop.f32.mrb[15].mxu0  ;;  %700 = vst [vmem:[#allocation7 + $0x178] sm:$0xff] %v1368_v42  ;;  %v1371_v46 = vpop.f32.mrb[15].mxu1  ;;  %v801_v54 = vmul.f32 %v1065_v40, %v1065_v40 }
 0x137   :  { %v861_v48 = vadd.f32 %v860_v39, %v798_v38  ;;  %666 = vst [vmem:[#allocation7 + $0x68] sm:$0xff] %v449_v44  ;;  %v729_v49 = vadd.f32 %v728_v37, %v449_v44  ;;  %v799_v50 = vmul.f32 %v449_v44, %v449_v44  ;;  %698 = vst [vmem:[#allocation7 + $0x168] sm:$0xff] %v1371_v46 }
 0x139   :  { %v730_v52 = vadd.f32 %v1064_v32, %v729_v49  ;;  %v862_v53 = vadd.f32 %v861_v48, %v799_v50 }
 0x13b   :  { %v863_v55 = vadd.f32 %v862_v53, %v800_v51  ;;  %v1068_v56 = vpop.f32.mrb[16].mxu0  ;;  %v731_v57 = vadd.f32 %v1065_v40, %v730_v52  ;;  %v1374_v59 = vpop.f32.mrb[16].mxu1 }
 0x13c   :  { %671 = vst [vmem:[#allocation7 + $0x90] sm:$0xff] %v1068_v56  ;;  %v462_v61 = vpop.f32.mrb[17].mxu0  ;;  %703 = vst [vmem:[#allocation7 + $0x190] sm:$0xff] %v1374_v59  ;;  %v1377_v62 = vpop.f32.mrb[17].mxu1  ;;  %v804_v11 = vmul.f32 %v1068_v56, %v1068_v56 }
 0x13d   :  { %669 = vst [vmem:[#allocation7 + $0x80] sm:$0xff] %v462_v61  ;;  %v732_v63 = vadd.f32 %v731_v57, %v462_v61  ;;  %v802_v0 = vmul.f32 %v462_v61, %v462_v61  ;;  %v864_v2 = vadd.f32 %v863_v55, %v801_v54  ;;  %v1069_v4 = vpop.f32.mrb[18].mxu0  ;;  %701 = vst [vmem:[#allocation7 + $0x180] sm:$0xff] %v1377_v62  ;;  %v1380_v5 = vpop.f32.mrb[18].mxu1 }
 0x13e   :  { %672 = vst [vmem:[#allocation7 + $0x98] sm:$0xff] %v1069_v4  ;;  %v465_v6 = vpop.f32.mrb[19].mxu0  ;;  %704 = vst [vmem:[#allocation7 + $0x198] sm:$0xff] %v1380_v5  ;;  %v1383_v7 = vpop.f32.mrb[19].mxu1  ;;  %v805_v15 = vmul.f32 %v1069_v4, %v1069_v4 }
 0x13f   :  { %v865_v8 = vadd.f32 %v864_v2, %v802_v0  ;;  %670 = vst [vmem:[#allocation7 + $0x88] sm:$0xff] %v465_v6  ;;  %v733_v9 = vadd.f32 %v732_v63, %v465_v6  ;;  %v803_v10 = vmul.f32 %v465_v6, %v465_v6  ;;  %702 = vst [vmem:[#allocation7 + $0x188] sm:$0xff] %v1383_v7 }
 0x141   :  { %v734_v12 = vadd.f32 %v1068_v56, %v733_v9  ;;  %v866_v13 = vadd.f32 %v865_v8, %v803_v10 }
 0x143   :  { %v867_v17 = vadd.f32 %v866_v13, %v804_v11  ;;  %v1072_v18 = vpop.f32.mrb[20].mxu0  ;;  %v735_v19 = vadd.f32 %v1069_v4, %v734_v12  ;;  %v1386_v20 = vpop.f32.mrb[20].mxu1 }
 0x144   :  { %675 = vst [vmem:[#allocation7 + $0xb0] sm:$0xff] %v1072_v18  ;;  %v478_v22 = vpop.f32.mrb[21].mxu0  ;;  %707 = vst [vmem:[#allocation7 + $0x1b0] sm:$0xff] %v1386_v20  ;;  %v1389_v24 = vpop.f32.mrb[21].mxu1  ;;  %v808_v37 = vmul.f32 %v1072_v18, %v1072_v18 }
 0x145   :  { %673 = vst [vmem:[#allocation7 + $0xa0] sm:$0xff] %v478_v22  ;;  %v736_v25 = vadd.f32 %v735_v19, %v478_v22  ;;  %v806_v26 = vmul.f32 %v478_v22, %v478_v22  ;;  %v868_v27 = vadd.f32 %v867_v17, %v805_v15  ;;  %v1073_v28 = vpop.f32.mrb[22].mxu0  ;;  %705 = vst [vmem:[#allocation7 + $0x1a0] sm:$0xff] %v1389_v24  ;;  %v1392_v29 = vpop.f32.mrb[22].mxu1 }
 0x146   :  { %676 = vst [vmem:[#allocation7 + $0xb8] sm:$0xff] %v1073_v28  ;;  %v481_v30 = vpop.f32.mrb[23].mxu0  ;;  %708 = vst [vmem:[#allocation7 + $0x1b8] sm:$0xff] %v1392_v29  ;;  %v1395_v31 = vpop.f32.mrb[23].mxu1  ;;  %v809_v40 = vmul.f32 %v1073_v28, %v1073_v28 }
 0x147   :  { %v869_v32 = vadd.f32 %v868_v27, %v806_v26  ;;  %674 = vst [vmem:[#allocation7 + $0xa8] sm:$0xff] %v481_v30  ;;  %v737_v33 = vadd.f32 %v736_v25, %v481_v30  ;;  %v807_v35 = vmul.f32 %v481_v30, %v481_v30  ;;  %706 = vst [vmem:[#allocation7 + $0x1a8] sm:$0xff] %v1395_v31 }
 0x149   :  { %v738_v38 = vadd.f32 %v1072_v18, %v737_v33  ;;  %v870_v39 = vadd.f32 %v869_v32, %v807_v35 }
 0x14b   :  { %v871_v44 = vadd.f32 %v870_v39, %v808_v37  ;;  %v1076_v48 = vpop.f32.mrb[24].mxu0  ;;  %v739_v49 = vadd.f32 %v1073_v28, %v738_v38  ;;  %v1398_v50 = vpop.f32.mrb[24].mxu1 }
 0x14c   :  { %679 = vst [vmem:[#allocation7 + $0xd0] sm:$0xff] %v1076_v48  ;;  %v494_v51 = vpop.f32.mrb[25].mxu0  ;;  %711 = vst [vmem:[#allocation7 + $0x1d0] sm:$0xff] %v1398_v50  ;;  %v1401_v52 = vpop.f32.mrb[25].mxu1  ;;  %v812_v6 = vmul.f32 %v1076_v48, %v1076_v48 }
 0x14d   :  { %677 = vst [vmem:[#allocation7 + $0xc0] sm:$0xff] %v494_v51  ;;  %v740_v53 = vadd.f32 %v739_v49, %v494_v51  ;;  %v810_v54 = vmul.f32 %v494_v51, %v494_v51  ;;  %v872_v55 = vadd.f32 %v871_v44, %v809_v40  ;;  %v1077_v56 = vpop.f32.mrb[26].mxu0  ;;  %709 = vst [vmem:[#allocation7 + $0x1c0] sm:$0xff] %v1401_v52  ;;  %v1404_v57 = vpop.f32.mrb[26].mxu1 }
 0x14e   :  { %680 = vst [vmem:[#allocation7 + $0xd8] sm:$0xff] %v1077_v56  ;;  %v497_v61 = vpop.f32.mrb[27].mxu0  ;;  %712 = vst [vmem:[#allocation7 + $0x1d8] sm:$0xff] %v1404_v57  ;;  %v1407_v63 = vpop.f32.mrb[27].mxu1  ;;  %v813_v10 = vmul.f32 %v1077_v56, %v1077_v56 }
 0x14f   :  { %v873_v0 = vadd.f32 %v872_v55, %v810_v54  ;;  %678 = vst [vmem:[#allocation7 + $0xc8] sm:$0xff] %v497_v61  ;;  %v741_v2 = vadd.f32 %v740_v53, %v497_v61  ;;  %v811_v4 = vmul.f32 %v497_v61, %v497_v61  ;;  %710 = vst [vmem:[#allocation7 + $0x1c8] sm:$0xff] %v1407_v63 }
 0x151   :  { %v742_v8 = vadd.f32 %v1076_v48, %v741_v2  ;;  %v874_v9 = vadd.f32 %v873_v0, %v811_v4 }
 0x153   :  { %v875_v11 = vadd.f32 %v874_v9, %v812_v6  ;;  %v1080_v12 = vpop.f32.mrb[28].mxu0  ;;  %v743_v13 = vadd.f32 %v1077_v56, %v742_v8  ;;  %v1410_v15 = vpop.f32.mrb[28].mxu1 }
 0x154   :  { %683 = vst [vmem:[#allocation7 + $0xf0] sm:$0xff] %v1080_v12  ;;  %v510_v17 = vpop.f32.mrb[29].mxu0  ;;  %715 = vst [vmem:[#allocation7 + $0x1f0] sm:$0xff] %v1410_v15  ;;  %v1413_v18 = vpop.f32.mrb[29].mxu1 }
 0x155   :  { %681 = vst [vmem:[#allocation7 + $0xe0] sm:$0xff] %v510_v17  ;;  %v744_v19 = vadd.f32 %v743_v13, %v510_v17  ;;  %v814_v22 = vmul.f32 %v510_v17, %v510_v17  ;;  %v876_v25 = vadd.f32 %v875_v11, %v813_v10  ;;  %v1081_v26 = vpop.f32.mrb[30].mxu0  ;;  %713 = vst [vmem:[#allocation7 + $0x1e0] sm:$0xff] %v1413_v18  ;;  %v1416_v27 = vpop.f32.mrb[30].mxu1 }
 0x156   :  { %684 = vst [vmem:[#allocation7 + $0xf8] sm:$0xff] %v1081_v26  ;;  %v513_v28 = vpop.f32.mrb[31].mxu0  ;;  %716 = vst [vmem:[#allocation7 + $0x1f8] sm:$0xff] %v1416_v27  ;;  %v1419_v30 = vpop.f32.mrb[31].mxu1 }
 0x157   :  { %v877_v32 = vadd.f32 %v876_v25, %v814_v22  ;;  %682 = vst [vmem:[#allocation7 + $0xe8] sm:$0xff] %v513_v28  ;;  %v745_v33 = vadd.f32 %v744_v19, %v513_v28  ;;  %v815_v35 = vmul.f32 %v513_v28, %v513_v28  ;;  %714 = vst [vmem:[#allocation7 + $0x1e8] sm:$0xff] %v1419_v30 }
 0x158   :  { %1233 = shalt.err (!%p1230_p6)
}
 0x159   :  { %s1234_s14 = scalar_lea.hbm %s1544_s2, 8192 }
 0x15a   :  { %p1235_p7 = scmp.ne.s32.totalorder %s1544_s2, %s1234_s14  ;;  %p1238_p8 = scmp.lt.u32.totalorder %s1234_s14, %s1544_s2 }
 0x15c   :  { %p1240_p9 = pnand %p1238_p8, %p1235_p7 }
 0x15e   :  { %1243 = shalt.err (!%p1240_p9)
}
 0x15f   :  { %s1279_s19 = smov 128   ;;  %s1280_s20 = smov 8   ;;  %v816_v37 = vmul.f32 %v1080_v12, %v1080_v12  ;;  %v746_v38 = vadd.f32 %v1080_v12, %v745_v33  ;;  %v878_v39 = vadd.f32 %v877_v32, %v815_v35  ;;  %v817_v40 = vmul.f32 %v1081_v26, %v1081_v26 }
 0x160   :  { %933 = dma.vmem_to_hbm [thread:$0]  %s928_s10, 8192, %s1544_s2, [#allocation4], %s1279_s19, %s1279_s19, %s1280_s20   ;;  %v818_v49 = vmul.f32 %v1329_v43, %v1329_v43  ;;  %v819_v56 = vmul.f32 %v1335_v47, %v1335_v47  ;;  %v820_v61 = vmul.f32 %v1326_v41, %v1326_v41  ;;  %v821_v4 = vmul.f32 %v1332_v45, %v1332_v45 }
 0x161   :  { %v879_v44 = vadd.f32 %v878_v39, %v816_v37  ;;  %v747_v48 = vadd.f32 %v1081_v26, %v746_v38  ;;  %v823_v12 = vmul.f32 %v1347_v3, %v1347_v3  ;;  %v827_v32 = vmul.f32 %v1359_v23, %v1359_v23  ;;  %s1281_s2 = smov [#allocation8]  }
 0x162   :  { %s940_s23 = sshll.u32 %s1281_s2, 4  ;;  %vm919_vm0 = vcmask 1040384   ;;  %s941_s23 = int_to_ptr.vmem [resolvable:$true] %s940_s23 }
 0x163   :  { %v748_v51 = vadd.f32 %v747_v48, %v1329_v43  ;;  %v880_v53 = vadd.f32 %v879_v44, %v817_v40  ;;  %v822_v43 = vmul.f32 %v1341_v60, %v1341_v60  ;;  %v831_v48 = vmul.f32 %v1371_v46, %v1371_v46  ;;  %s1244_s24 = scalar_lea.vmem %s941_s23, 32  ;;  %p1249_p11 = scmp.lt.s32.totalorder %s941_s23, %s941_s23 }
 0x164   :  { %p1245_p10 = scmp.ne.s32.totalorder %s941_s23, %s1244_s24  ;;  %p1250_p12 = scmp.lt.s32.totalorder %s1244_s24, %s1244_s24 }
 0x165   :  { %v881_v54 = vadd.f32 %v880_v53, %v818_v49  ;;  %v749_v55 = vadd.f32 %v748_v51, %v1335_v47 }
 0x166   :  { %p1251_p13 = por %p1250_p12, %p1249_p11 }
 0x167   :  { %v750_v0 = vadd.f32 %v1326_v41, %v749_v55  ;;  %v882_v2 = vadd.f32 %v881_v54, %v819_v56  ;;  %v824_v41 = vmul.f32 %v1338_v58, %v1338_v58 }
 0x168   :  { %p1252_p0 = pnand %p1251_p13, %p1245_p10 }
 0x169   :  { %v883_v6 = vadd.f32 %v882_v2, %v820_v61  ;;  %v751_v8 = vadd.f32 %v1332_v45, %v750_v0  ;;  %v825_v45 = vmul.f32 %v1344_v1, %v1344_v1  ;;  %v835_v0 = vmul.f32 %v1383_v7, %v1383_v7 }
 0x16b   :  { %v752_v9 = vadd.f32 %v751_v8, %v1341_v60  ;;  %v884_v10 = vadd.f32 %v883_v6, %v821_v4  ;;  %v826_v60 = vmul.f32 %v1353_v16, %v1353_v16 }
 0x16d   :  { %v885_v11 = vadd.f32 %v884_v10, %v822_v43  ;;  %v753_v47 = vadd.f32 %v752_v9, %v1347_v3 }
 0x16f   :  { %v754_v13 = vadd.f32 %v1338_v58, %v753_v47  ;;  %v886_v17 = vadd.f32 %v885_v11, %v823_v12  ;;  %v828_v58 = vmul.f32 %v1350_v14, %v1350_v14  ;;  %v839_v11 = vmul.f32 %v1395_v31, %v1395_v31 }
 0x171   :  { %v887_v19 = vadd.f32 %v886_v17, %v824_v41  ;;  %v755_v22 = vadd.f32 %v1344_v1, %v754_v13  ;;  %v829_v1 = vmul.f32 %v1356_v21, %v1356_v21 }
 0x173   :  { %v756_v25 = vadd.f32 %v755_v22, %v1353_v16  ;;  %v888_v26 = vadd.f32 %v887_v19, %v825_v45  ;;  %v830_v16 = vmul.f32 %v1365_v36, %v1365_v36  ;;  %v843_v22 = vmul.f32 %v1407_v63, %v1407_v63 }
 0x175   :  { %v889_v28 = vadd.f32 %v888_v26, %v826_v60  ;;  %v757_v3 = vadd.f32 %v756_v25, %v1359_v23 }
 0x177   :  { %v758_v33 = vadd.f32 %v1350_v14, %v757_v3  ;;  %v890_v35 = vadd.f32 %v889_v28, %v827_v32  ;;  %v832_v14 = vmul.f32 %v1362_v34, %v1362_v34 }
 0x179   :  { %v891_v37 = vadd.f32 %v890_v35, %v828_v58  ;;  %v759_v38 = vadd.f32 %v1356_v21, %v758_v33  ;;  %v833_v21 = vmul.f32 %v1368_v42, %v1368_v42  ;;  %v847_v33 = vmul.f32 %v1419_v30, %v1419_v30 }
 0x17b   :  { %v760_v39 = vadd.f32 %v759_v38, %v1365_v36  ;;  %v892_v40 = vadd.f32 %v891_v37, %v829_v1  ;;  %v834_v36 = vmul.f32 %v1377_v62, %v1377_v62 }
 0x17d   :  { %v893_v44 = vadd.f32 %v892_v40, %v830_v16  ;;  %v761_v23 = vadd.f32 %v760_v39, %v1371_v46 }
 0x17f   :  { %v762_v49 = vadd.f32 %v1362_v34, %v761_v23  ;;  %v894_v51 = vadd.f32 %v893_v44, %v831_v48  ;;  %v836_v34 = vmul.f32 %v1374_v59, %v1374_v59 }
 0x181   :  { %v895_v53 = vadd.f32 %v894_v51, %v832_v14  ;;  %v763_v54 = vadd.f32 %v1368_v42, %v762_v49  ;;  %v837_v42 = vmul.f32 %v1380_v5, %v1380_v5 }
 0x183   :  { %v764_v55 = vadd.f32 %v763_v54, %v1377_v62  ;;  %v896_v56 = vadd.f32 %v895_v53, %v833_v21  ;;  %v838_v62 = vmul.f32 %v1389_v24, %v1389_v24 }
 0x185   :  { %v897_v61 = vadd.f32 %v896_v56, %v834_v36  ;;  %v765_v46 = vadd.f32 %v764_v55, %v1383_v7 }
 0x187   :  { %v766_v2 = vadd.f32 %v1374_v59, %v765_v46  ;;  %v898_v4 = vadd.f32 %v897_v61, %v835_v0  ;;  %v840_v59 = vmul.f32 %v1386_v20, %v1386_v20 }
 0x189   :  { %v899_v6 = vadd.f32 %v898_v4, %v836_v34  ;;  %v767_v8 = vadd.f32 %v1380_v5, %v766_v2  ;;  %v841_v5 = vmul.f32 %v1392_v29, %v1392_v29 }
 0x18b   :  { %v768_v43 = vadd.f32 %v767_v8, %v1389_v24  ;;  %v900_v9 = vadd.f32 %v899_v6, %v837_v42  ;;  %v842_v24 = vmul.f32 %v1401_v52, %v1401_v52 }
 0x18d   :  { %v901_v10 = vadd.f32 %v900_v9, %v838_v62  ;;  %v769_v7 = vadd.f32 %v768_v43, %v1395_v31 }
 0x18f   :  { %v770_v47 = vadd.f32 %v1386_v20, %v769_v7  ;;  %v902_v12 = vadd.f32 %v901_v10, %v839_v11  ;;  %v844_v20 = vmul.f32 %v1398_v50, %v1398_v50 }
 0x191   :  { %v903_v41 = vadd.f32 %v902_v12, %v840_v59  ;;  %v771_v13 = vadd.f32 %v1392_v29, %v770_v47  ;;  %v845_v29 = vmul.f32 %v1404_v57, %v1404_v57 }
 0x193   :  { %v772_v17 = vadd.f32 %v771_v13, %v1401_v52  ;;  %v904_v45 = vadd.f32 %v903_v41, %v841_v5  ;;  %v846_v52 = vmul.f32 %v1413_v18, %v1413_v18 }
 0x195   :  { %v905_v19 = vadd.f32 %v904_v45, %v842_v24  ;;  %v773_v31 = vadd.f32 %v772_v17, %v1407_v63 }
 0x197   :  { %v774_v60 = vadd.f32 %v1398_v50, %v773_v31  ;;  %v906_v25 = vadd.f32 %v905_v19, %v843_v22  ;;  %v848_v50 = vmul.f32 %v1410_v15, %v1410_v15 }
 0x199   :  { %v907_v26 = vadd.f32 %v906_v25, %v844_v20  ;;  %v775_v28 = vadd.f32 %v1404_v57, %v774_v60  ;;  %v849_v57 = vmul.f32 %v1416_v27, %v1416_v27 }
 0x19b   :  { %v776_v3 = vadd.f32 %v775_v28, %v1413_v18  ;;  %v908_v32 = vadd.f32 %v907_v26, %v845_v29 }
 0x19d   :  { %v909_v58 = vadd.f32 %v908_v32, %v846_v52  ;;  %v777_v63 = vadd.f32 %v776_v3, %v1419_v30 }
 0x19f   :  { %v778_v35 = vadd.f32 %v1410_v15, %v777_v63  ;;  %v910_v1 = vadd.f32 %v909_v58, %v847_v33 }
 0x1a1   :  { %v779_v37 = vadd.f32 %v1416_v27, %v778_v35  ;;  %v911_v38 = vadd.f32 %v910_v1, %v848_v50 }
 0x1a3   :  { %v780_v18 = vrot.slane %v779_v37, 4  ;;  %v912_v16 = vadd.f32 %v911_v38, %v849_v57 }
 0x1a5   :  { %v781_v39 = vadd.f32 %v780_v18, %v779_v37  ;;  %v913_v40 = vrot.slane %v912_v16, 4 }
 0x1a7   :  { %v782_v44 = vrot.slane %v781_v39, 2  ;;  %v914_v23 = vadd.f32 %v913_v40, %v912_v16 }
 0x1a9   :  { %v783_v48 = vadd.f32 %v782_v44, %v781_v39  ;;  %v915_v30 = vrot.slane %v914_v23, 2 }
 0x1ab   :  { %v784_v14 = vrot.slane %v783_v48, 1  ;;  %v916_v49 = vadd.f32 %v915_v30, %v914_v23 }
 0x1ad   :  { %v917_v51 = vrot.slane %v916_v49, 1  ;;  %v785_v15 = vadd.f32 %v784_v14, %v783_v48 }
 0x1af   :  { %v918_v21 = vadd.f32 %v917_v51, %v916_v49 }
 0x1b1   :  { %v920_v53 = vsel %vm919_vm0, %v785_v15, %v918_v21 }
 0x1b2   :  { %921 = vst [vmem:[#allocation8] sm:$0x3] %v920_v53 }
 0x1b3   :  { %1255 = shalt.err (!%p1252_p0)
}
 0x1b4   :  { %s1256_s27 = scalar_lea.hbm %s1545_s3, 32 }
 0x1b5   :  { %p1257_p1 = scmp.ne.s32.totalorder %s1545_s3, %s1256_s27  ;;  %p1260_p2 = scmp.lt.u32.totalorder %s1256_s27, %s1545_s3 }
 0x1b7   :  { %p1262_p3 = pnand %p1260_p2, %p1257_p1 }
 0x1b9   :  { %1265 = shalt.err (!%p1262_p3)
}
 0x1ba   :  { %943 = dma.vmem_to_hbm [thread:$0]  %s941_s23, 32, %s1545_s3, [#allocation9]  }
 0x1bb   :  { %1270 = dma.done.wait [#allocation4], 8192  }
 0x1bc   :  { %1271 = vsyncadd [#allocation4], 4294959104 }
 0x1bd   :  { %1272 = dma.done.wait [#allocation9], 32  }
 0x1be   :  { %1273 = vsyncadd [#allocation9], 4294967264 }
 0x1bf   :  { %950 = vsyncpa [#allocation3], 1 }
 0x1c0   :  { %951 = vsyncpa [#allocation6], 1 }
 0x1c1   :  { %952 = vsyncpa [#allocation4], 1 }
 0x1c2   :  { %953 = vsyncpa [#allocation9], 1 }

</bundles_post_ra>
